<compile_context>
chip_gen: v6e
topology: v6e:2x2x1
jax: 0.10.0
libtpu: 0.0.40
codegen_flags: <defaults>
</compile_context>

<pallas_src>
import jax
import jax.numpy as jnp
from jax.experimental import pallas as pl
from jax.experimental.pallas import tpu as pltpu

LN_EPS = 1e-5  # PyTorch nn.LayerNorm default


def _round_up(x, m):
    return ((x + m - 1) // m) * m


# --------------------------------------------------------------------------- #
# Kernel
# --------------------------------------------------------------------------- #
def _autoencode_kernel(x_ref, g_ref, b_ref,
                       we0_ref, be0_ref, we1_ref, be1_ref, we2_ref, be2_ref,
                       wd0_ref, bd0_ref, wd1_ref, bd1_ref, wd2_ref, bd2_ref,
                       wfc1_ref, bfc1_ref, wfc2_ref,
                       out_ref):
    f32, bf16 = jnp.float32, jnp.bfloat16

    # LayerNorm affine params: loaded once, shared by both layernorms.
    gamma = g_ref[...]          # (1, S*D) f32
    beta = b_ref[...]           # (1, S*D) f32

    def layernorm(v):
        # Single-pass statistics: var = E[x^2] - mu^2 (one read of the slab).
        mu = jnp.mean(v, axis=-1, keepdims=True)
        var = jnp.mean(v * v, axis=-1, keepdims=True) - mu * mu
        return (v - mu) * jax.lax.rsqrt(var + LN_EPS) * gamma + beta

    def linear_relu(v_bf16, w_ref, bias_ref):
        acc = jnp.dot(v_bf16, w_ref[...], preferred_element_type=f32) + bias_ref[...]
        return jnp.maximum(acc, 0.0)

    # ---- x_ln = layernorm(x) ------------------------------------------------
    x_ln = layernorm(x_ref[...])                              # (TN, S*D) f32

    # ---- encoder (encoder[0] is a block-diagonal dense matmul) --------------
    h0 = linear_relu(x_ln.astype(bf16), we0_ref, be0_ref)     # (TN, 16S)
    h1 = linear_relu(h0.astype(bf16), we1_ref, be1_ref)       # (TN, 4S)
    z = linear_relu(h1.astype(bf16), we2_ref, be2_ref)        # (TN, R)
    z_bf = z.astype(bf16)

    # ---- decoder (decoder[2] is a block-diagonal dense matmul) --------------
    d0 = linear_relu(z_bf, wd0_ref, bd0_ref)                  # (TN, 4S)
    d1 = linear_relu(d0.astype(bf16), wd1_ref, bd1_ref)       # (TN, 16S)
    x_d = linear_relu(d1.astype(bf16), wd2_ref, bd2_ref)      # (TN, S*D)

    # ---- layernorm(x_d); fc2 fused on the f32 difference (bfc2 cancels) -----
    xd_ln = layernorm(x_d)
    diff = (xd_ln - x_ln).astype(bf16)
    out = (jnp.dot(diff, wfc2_ref[...], preferred_element_type=f32)
           + jnp.dot(z_bf, wfc1_ref[...], preferred_element_type=f32)
           + bfc1_ref[...])
    out_ref[...] = out.astype(out_ref.dtype)


# --------------------------------------------------------------------------- #
# One-time weight preparation (hoisted out of the forward path)
# --------------------------------------------------------------------------- #
def prepare_params(params):
    """bf16 casts, kron(I_S, W) block-diagonal weights for the per-token
    layers, lane padding of the fc heads, and bias reshapes/tiling.
    Call once; reuse the result for every forward call."""
    f32, bf16 = jnp.float32, jnp.bfloat16
    S, D = params["ln_g"].shape
    out_dim = params["wfc1"].shape[1]
    out_pad = _round_up(out_dim, 128)
    eye = jnp.eye(S, dtype=f32)

    def row(v):
        return v.reshape(1, -1).astype(f32)

    return {
        "ln_g": params["ln_g"].reshape(1, S * D).astype(f32),
        "ln_b": params["ln_b"].reshape(1, S * D).astype(f32),
        # encoder[0] / decoder[2] as VMEM-resident block-diagonal weights.
        "we0": jnp.kron(eye, params["we0"]).astype(bf16),     # (S*D, 16*S)
        "be0": row(jnp.tile(params["be0"], S)),               # (1, 16*S)
        "we1": params["we1"].astype(bf16),
        "be1": row(params["be1"]),
        "we2": params["we2"].astype(bf16),
        "be2": row(params["be2"]),
        "wd0": params["wd0"].astype(bf16),
        "bd0": row(params["bd0"]),
        "wd1": params["wd1"].astype(bf16),
        "bd1": row(params["bd1"]),
        "wd2": jnp.kron(eye, params["wd2"]).astype(bf16),     # (16*S, S*D)
        "bd2": row(jnp.tile(params["bd2"], S)),               # (1, S*D)
        "wfc1": jnp.pad(params["wfc1"],
                        ((0, 0), (0, out_pad - out_dim))).astype(bf16),
        "bfc1": row(jnp.pad(params["bfc1"], (0, out_pad - out_dim))),
        "wfc2": jnp.pad(params["wfc2"],
                        ((0, 0), (0, out_pad - out_dim))).astype(bf16),
        # bfc2 never needed: fc2(xd_ln) - fc2(x_ln) cancels it exactly.
    }


def _tile_and_vmem(N, tile_n):
    """Generation-aware batch-tile and scoped-VMEM defaults."""
    try:
        kind = jax.devices()[0].device_kind.lower()
    except Exception:
        kind = ""
    is_v7 = "7" in kind        # "tpu7x"/"tpu v7x"; v4/v5e/v6e have no '7'
    if is_v7:
        vmem_limit = 40 * 1024 * 1024          # 64 MiB physical per TC on v7x
        if tile_n is None:
            # >= 2 grid steps when there is enough work so ("parallel",) can
            # shard across v7x's two TensorCores.
            tile_n = N if N <= 8 else min(256, _round_up(pl.cdiv(N, 2), 8))
    else:
        vmem_limit = 96 * 1024 * 1024          # 128 MiB physical on v5e/v6e
        if tile_n is None:
            tile_n = N if N <= 512 else 512
    return tile_n, vmem_limit


# --------------------------------------------------------------------------- #
# Forward
# --------------------------------------------------------------------------- #
def autoencode_forward(x, prep, *, out_dim, tile_n=None, vmem_limit_bytes=None):
    N, S, D = x.shape
    f32 = jnp.float32
    out_pad = prep["wfc1"].shape[-1]

    tile_n, vmem_default = _tile_and_vmem(N, tile_n)
    if vmem_limit_bytes is None:
        vmem_limit_bytes = vmem_default

    x_flat = x.reshape(N, S * D).astype(f32)

    order = ["ln_g", "ln_b", "we0", "be0", "we1", "be1", "we2", "be2",
             "wd0", "bd0", "wd1", "bd1", "wd2", "bd2", "wfc1", "bfc1", "wfc2"]
    weights = [prep[k] for k in order]

    def resident_spec(a):                      # same block every grid step
        return pl.BlockSpec(a.shape, lambda i: (0, 0))

    in_specs = ([pl.BlockSpec((tile_n, S * D), lambda i: (i, 0))]   # batch-blocked
                + [resident_spec(a) for a in weights])

    out = pl.pallas_call(
        _autoencode_kernel,
        out_shape=jax.ShapeDtypeStruct((N, out_pad), f32),
        grid=(pl.cdiv(N, tile_n),),
        in_specs=in_specs,
        out_specs=pl.BlockSpec((tile_n, out_pad), lambda i: (i, 0)),
        compiler_params=pltpu.CompilerParams(
            dimension_semantics=("parallel",),
            vmem_limit_bytes=vmem_limit_bytes),
    )(x_flat, *weights)
    return out[:, :out_dim]


# --------------------------------------------------------------------------- #
# Parameter init + pure-JAX reference (verification)
# --------------------------------------------------------------------------- #
def init_params(key, input_dim, sequence_length, represent_dim, out_dim):
    D, S, R = input_dim, sequence_length, represent_dim
    shapes = dict(
        we0=(D, 16), be0=(16,),
        we1=(16 * S, 4 * S), be1=(4 * S,),
        we2=(4 * S, R), be2=(R,),
        wd0=(R, 4 * S), bd0=(4 * S,),
        wd1=(4 * S, 16 * S), bd1=(16 * S,),
        wd2=(16, D), bd2=(D,),
        wfc1=(R, out_dim), bfc1=(out_dim,),
        wfc2=(S * D, out_dim), bfc2=(out_dim,),
    )
    params = {}
    keys = jax.random.split(key, len(shapes))
    for k, (name, shape) in zip(keys, sorted(shapes.items())):
        params[name] = 0.1 * jax.random.normal(k, shape, dtype=jnp.float32)
    params["ln_g"] = jnp.ones((S, D), jnp.float32)   # PyTorch LayerNorm init
    params["ln_b"] = jnp.zeros((S, D), jnp.float32)
    return params


def ref_forward(x, p):
    """Pure-JAX (all-f32) mirror of the PyTorch forward."""
    N, S, D = x.shape

    def ln(v3):
        vf = v3.reshape(N, S * D)
        mu = jnp.mean(vf, -1, keepdims=True)
        var = jnp.mean((vf - mu) ** 2, -1, keepdims=True)
        vn = ((vf - mu) / jnp.sqrt(var + LN_EPS)).reshape(N, S, D)
        return vn * p["ln_g"] + p["ln_b"]

    x_ln = ln(x)
    h0 = jax.nn.relu(x_ln @ p["we0"] + p["be0"])                      # (N,S,16)
    h1 = jax.nn.relu(h0.reshape(N, -1) @ p["we1"] + p["be1"])         # (N,4S)
    z = jax.nn.relu(h1 @ p["we2"] + p["be2"])                         # (N,R)
    d0 = jax.nn.relu(z @ p["wd0"] + p["bd0"])
    d1 = jax.nn.relu(d0 @ p["wd1"] + p["bd1"])
    d2 = jax.nn.relu(d1.reshape(N, S, 16) @ p["wd2"] + p["bd2"])      # (N,S,D)
    xd_ln = ln(d2)
    fc2_xd = xd_ln.reshape(N, -1) @ p["wfc2"] + p["bfc2"]
    fc2_x = x_ln.reshape(N, -1) @ p["wfc2"] + p["bfc2"]
    fc1_z = z @ p["wfc1"] + p["bfc1"]
    return fc2_xd - fc2_x + fc1_z


if __name__ == "__main__":
    N, INPUT_DIM, SEQ, REPR, OUT = 2, 4, 8, 16, 2
    key = jax.random.PRNGKey(0)
    kx, kp = jax.random.split(key)
    x = jax.random.normal(kx, (N, SEQ, INPUT_DIM), dtype=jnp.float32)
    params = init_params(kp, INPUT_DIM, SEQ, REPR, OUT)

    prep = prepare_params(params)          # one-time weight prep, out of the hot path
    out = jax.block_until_ready(autoencode_forward(x, prep, out_dim=OUT))
    assert out.shape == (N, OUT)

    ref = jax.block_until_ready(ref_forward(x, params))
    # Kernel uses bf16 MXU inputs (f32 accumulation) vs an all-f32 reference.
    if not jnp.allclose(out, ref, atol=5e-2, rtol=1e-1):
        raise AssertionError(f"kernel/reference mismatch:\n{out}\nvs\n{ref}")

    print("KERNEL_OK")
</pallas_src>

<mosaic_0001>
module attributes {stable_mosaic.version = 11 : i64} {
  func.func @_autoencode_kernel(%arg0: i32, %arg1: memref<2x32xf32, #tpu.memory_space<vmem>>, %arg2: memref<1x32xf32, #tpu.memory_space<vmem>>, %arg3: memref<1x32xf32, #tpu.memory_space<vmem>>, %arg4: memref<32x128xbf16, #tpu.memory_space<vmem>>, %arg5: memref<1x128xf32, #tpu.memory_space<vmem>>, %arg6: memref<128x32xbf16, #tpu.memory_space<vmem>>, %arg7: memref<1x32xf32, #tpu.memory_space<vmem>>, %arg8: memref<32x16xbf16, #tpu.memory_space<vmem>>, %arg9: memref<1x16xf32, #tpu.memory_space<vmem>>, %arg10: memref<16x32xbf16, #tpu.memory_space<vmem>>, %arg11: memref<1x32xf32, #tpu.memory_space<vmem>>, %arg12: memref<32x128xbf16, #tpu.memory_space<vmem>>, %arg13: memref<1x128xf32, #tpu.memory_space<vmem>>, %arg14: memref<128x32xbf16, #tpu.memory_space<vmem>>, %arg15: memref<1x32xf32, #tpu.memory_space<vmem>>, %arg16: memref<16x128xbf16, #tpu.memory_space<vmem>>, %arg17: memref<1x128xf32, #tpu.memory_space<vmem>>, %arg18: memref<32x128xbf16, #tpu.memory_space<vmem>>, %arg19: memref<2x128xf32, #tpu.memory_space<vmem>>) attributes {dimension_semantics = [#tpu.dimension_semantics<parallel>], iteration_bounds = array<i64: 1>, scalar_prefetch = 0 : i64, scratch_operands = 0 : i64, tpu.core_type = #tpu.core_type<tc>, window_params = [{transform_indices = @transform_0, window_bounds = array<i64: 2, 32>}, {pipeline_mode = #tpu.pipeline_mode<synchronous>, transform_indices = @transform_1, window_bounds = array<i64: 1, 32>}, {pipeline_mode = #tpu.pipeline_mode<synchronous>, transform_indices = @transform_2, window_bounds = array<i64: 1, 32>}, {pipeline_mode = #tpu.pipeline_mode<synchronous>, transform_indices = @transform_3, window_bounds = array<i64: 32, 128>}, {pipeline_mode = #tpu.pipeline_mode<synchronous>, transform_indices = @transform_4, window_bounds = array<i64: 1, 128>}, {pipeline_mode = #tpu.pipeline_mode<synchronous>, transform_indices = @transform_5, window_bounds = array<i64: 128, 32>}, {pipeline_mode = #tpu.pipeline_mode<synchronous>, transform_indices = @transform_6, window_bounds = array<i64: 1, 32>}, {pipeline_mode = #tpu.pipeline_mode<synchronous>, transform_indices = @transform_7, window_bounds = array<i64: 32, 16>}, {pipeline_mode = #tpu.pipeline_mode<synchronous>, transform_indices = @transform_8, window_bounds = array<i64: 1, 16>}, {pipeline_mode = #tpu.pipeline_mode<synchronous>, transform_indices = @transform_9, window_bounds = array<i64: 16, 32>}, {pipeline_mode = #tpu.pipeline_mode<synchronous>, transform_indices = @transform_10, window_bounds = array<i64: 1, 32>}, {pipeline_mode = #tpu.pipeline_mode<synchronous>, transform_indices = @transform_11, window_bounds = array<i64: 32, 128>}, {pipeline_mode = #tpu.pipeline_mode<synchronous>, transform_indices = @transform_12, window_bounds = array<i64: 1, 128>}, {pipeline_mode = #tpu.pipeline_mode<synchronous>, transform_indices = @transform_13, window_bounds = array<i64: 128, 32>}, {pipeline_mode = #tpu.pipeline_mode<synchronous>, transform_indices = @transform_14, window_bounds = array<i64: 1, 32>}, {pipeline_mode = #tpu.pipeline_mode<synchronous>, transform_indices = @transform_15, window_bounds = array<i64: 16, 128>}, {pipeline_mode = #tpu.pipeline_mode<synchronous>, transform_indices = @transform_16, window_bounds = array<i64: 1, 128>}, {pipeline_mode = #tpu.pipeline_mode<synchronous>, transform_indices = @transform_17, window_bounds = array<i64: 32, 128>}, {transform_indices = @transform_18, window_bounds = array<i64: 2, 128>}]} {
    %c0 = arith.constant 0 : index
    %c0_0 = arith.constant 0 : index
    %0 = vector.load %arg2[%c0, %c0_0] : memref<1x32xf32, #tpu.memory_space<vmem>>, vector<1x32xf32>
    %c0_1 = arith.constant 0 : index
    %c0_2 = arith.constant 0 : index
    %1 = vector.load %arg3[%c0_1, %c0_2] : memref<1x32xf32, #tpu.memory_space<vmem>>, vector<1x32xf32>
    %c0_3 = arith.constant 0 : index
    %c0_4 = arith.constant 0 : index
    %2 = vector.load %arg1[%c0_3, %c0_4] : memref<2x32xf32, #tpu.memory_space<vmem>>, vector<2x32xf32>
    %cst = arith.constant dense<0.000000e+00> : vector<2xf32>
    %3 = vector.multi_reduction <add>, %2, %cst [1] : vector<2x32xf32> to vector<2xf32>
    %4 = vector.shape_cast %3 : vector<2xf32> to vector<2x1xf32>
    %cst_5 = arith.constant 3.200000e+01 : f32
    %5 = vector.broadcast %cst_5 : f32 to vector<2x1xf32>
    %6 = arith.divf %4, %5 : vector<2x1xf32>
    %7 = arith.mulf %2, %2 : vector<2x32xf32>
    %cst_6 = arith.constant dense<0.000000e+00> : vector<2xf32>
    %8 = vector.multi_reduction <add>, %7, %cst_6 [1] : vector<2x32xf32> to vector<2xf32>
    %9 = vector.shape_cast %8 : vector<2xf32> to vector<2x1xf32>
    %cst_7 = arith.constant 3.200000e+01 : f32
    %10 = vector.broadcast %cst_7 : f32 to vector<2x1xf32>
    %11 = arith.divf %9, %10 : vector<2x1xf32>
    %12 = arith.mulf %6, %6 : vector<2x1xf32>
    %13 = arith.subf %11, %12 : vector<2x1xf32>
    %14 = vector.broadcast %6 : vector<2x1xf32> to vector<2x32xf32>
    %15 = arith.subf %2, %14 : vector<2x32xf32>
    %cst_8 = arith.constant 9.99999974E-6 : f32
    %16 = vector.broadcast %cst_8 : f32 to vector<2x1xf32>
    %17 = arith.addf %13, %16 : vector<2x1xf32>
    %18 = math.rsqrt %17 : vector<2x1xf32>
    %19 = vector.broadcast %18 : vector<2x1xf32> to vector<2x32xf32>
    %20 = arith.mulf %15, %19 : vector<2x32xf32>
    %21 = vector.broadcast %0 : vector<1x32xf32> to vector<2x32xf32>
    %22 = arith.mulf %20, %21 : vector<2x32xf32>
    %23 = vector.broadcast %1 : vector<1x32xf32> to vector<2x32xf32>
    %24 = arith.addf %22, %23 : vector<2x32xf32>
    %25 = arith.truncf %24 : vector<2x32xf32> to vector<2x32xbf16>
    %c0_9 = arith.constant 0 : index
    %c0_10 = arith.constant 0 : index
    %26 = vector.load %arg4[%c0_9, %c0_10] : memref<32x128xbf16, #tpu.memory_space<vmem>>, vector<32x128xbf16>
    %cst_11 = arith.constant dense<0.000000e+00> : vector<2x128xf32>
    %27 = tpu.matmul %25, %26, %cst_11 {dimension_numbers = #tpu.dot_dimension_numbers<[1], [0], [0], [1], [0, 0, 1, 1], [], []>} : vector<2x32xbf16>, vector<32x128xbf16>, vector<2x128xf32> -> vector<2x128xf32>
    %c0_12 = arith.constant 0 : index
    %c0_13 = arith.constant 0 : index
    %28 = vector.load %arg5[%c0_12, %c0_13] : memref<1x128xf32, #tpu.memory_space<vmem>>, vector<1x128xf32>
    %29 = vector.broadcast %28 : vector<1x128xf32> to vector<2x128xf32>
    %30 = arith.addf %27, %29 : vector<2x128xf32>
    %cst_14 = arith.constant 0.000000e+00 : f32
    %31 = vector.broadcast %cst_14 : f32 to vector<2x128xf32>
    %32 = arith.maximumf %30, %31 : vector<2x128xf32>
    %33 = arith.truncf %32 : vector<2x128xf32> to vector<2x128xbf16>
    %c0_15 = arith.constant 0 : index
    %c0_16 = arith.constant 0 : index
    %34 = vector.load %arg6[%c0_15, %c0_16] : memref<128x32xbf16, #tpu.memory_space<vmem>>, vector<128x32xbf16>
    %cst_17 = arith.constant dense<0.000000e+00> : vector<2x32xf32>
    %35 = tpu.matmul %33, %34, %cst_17 {dimension_numbers = #tpu.dot_dimension_numbers<[1], [0], [0], [1], [0, 0, 1, 1], [], []>} : vector<2x128xbf16>, vector<128x32xbf16>, vector<2x32xf32> -> vector<2x32xf32>
    %c0_18 = arith.constant 0 : index
    %c0_19 = arith.constant 0 : index
    %36 = vector.load %arg7[%c0_18, %c0_19] : memref<1x32xf32, #tpu.memory_space<vmem>>, vector<1x32xf32>
    %37 = vector.broadcast %36 : vector<1x32xf32> to vector<2x32xf32>
    %38 = arith.addf %35, %37 : vector<2x32xf32>
    %cst_20 = arith.constant 0.000000e+00 : f32
    %39 = vector.broadcast %cst_20 : f32 to vector<2x32xf32>
    %40 = arith.maximumf %38, %39 : vector<2x32xf32>
    %41 = arith.truncf %40 : vector<2x32xf32> to vector<2x32xbf16>
    %c0_21 = arith.constant 0 : index
    %c0_22 = arith.constant 0 : index
    %42 = vector.load %arg8[%c0_21, %c0_22] : memref<32x16xbf16, #tpu.memory_space<vmem>>, vector<32x16xbf16>
    %cst_23 = arith.constant dense<0.000000e+00> : vector<2x16xf32>
    %43 = tpu.matmul %41, %42, %cst_23 {dimension_numbers = #tpu.dot_dimension_numbers<[1], [0], [0], [1], [0, 0, 1, 1], [], []>} : vector<2x32xbf16>, vector<32x16xbf16>, vector<2x16xf32> -> vector<2x16xf32>
    %c0_24 = arith.constant 0 : index
    %c0_25 = arith.constant 0 : index
    %44 = vector.load %arg9[%c0_24, %c0_25] : memref<1x16xf32, #tpu.memory_space<vmem>>, vector<1x16xf32>
    %45 = vector.broadcast %44 : vector<1x16xf32> to vector<2x16xf32>
    %46 = arith.addf %43, %45 : vector<2x16xf32>
    %cst_26 = arith.constant 0.000000e+00 : f32
    %47 = vector.broadcast %cst_26 : f32 to vector<2x16xf32>
    %48 = arith.maximumf %46, %47 : vector<2x16xf32>
    %49 = arith.truncf %48 : vector<2x16xf32> to vector<2x16xbf16>
    %c0_27 = arith.constant 0 : index
    %c0_28 = arith.constant 0 : index
    %50 = vector.load %arg10[%c0_27, %c0_28] : memref<16x32xbf16, #tpu.memory_space<vmem>>, vector<16x32xbf16>
    %cst_29 = arith.constant dense<0.000000e+00> : vector<2x32xf32>
    %51 = tpu.matmul %49, %50, %cst_29 {dimension_numbers = #tpu.dot_dimension_numbers<[1], [0], [0], [1], [0, 0, 1, 1], [], []>} : vector<2x16xbf16>, vector<16x32xbf16>, vector<2x32xf32> -> vector<2x32xf32>
    %c0_30 = arith.constant 0 : index
    %c0_31 = arith.constant 0 : index
    %52 = vector.load %arg11[%c0_30, %c0_31] : memref<1x32xf32, #tpu.memory_space<vmem>>, vector<1x32xf32>
    %53 = vector.broadcast %52 : vector<1x32xf32> to vector<2x32xf32>
    %54 = arith.addf %51, %53 : vector<2x32xf32>
    %cst_32 = arith.constant 0.000000e+00 : f32
    %55 = vector.broadcast %cst_32 : f32 to vector<2x32xf32>
    %56 = arith.maximumf %54, %55 : vector<2x32xf32>
    %57 = arith.truncf %56 : vector<2x32xf32> to vector<2x32xbf16>
    %c0_33 = arith.constant 0 : index
    %c0_34 = arith.constant 0 : index
    %58 = vector.load %arg12[%c0_33, %c0_34] : memref<32x128xbf16, #tpu.memory_space<vmem>>, vector<32x128xbf16>
    %cst_35 = arith.constant dense<0.000000e+00> : vector<2x128xf32>
    %59 = tpu.matmul %57, %58, %cst_35 {dimension_numbers = #tpu.dot_dimension_numbers<[1], [0], [0], [1], [0, 0, 1, 1], [], []>} : vector<2x32xbf16>, vector<32x128xbf16>, vector<2x128xf32> -> vector<2x128xf32>
    %c0_36 = arith.constant 0 : index
    %c0_37 = arith.constant 0 : index
    %60 = vector.load %arg13[%c0_36, %c0_37] : memref<1x128xf32, #tpu.memory_space<vmem>>, vector<1x128xf32>
    %61 = vector.broadcast %60 : vector<1x128xf32> to vector<2x128xf32>
    %62 = arith.addf %59, %61 : vector<2x128xf32>
    %cst_38 = arith.constant 0.000000e+00 : f32
    %63 = vector.broadcast %cst_38 : f32 to vector<2x128xf32>
    %64 = arith.maximumf %62, %63 : vector<2x128xf32>
    %65 = arith.truncf %64 : vector<2x128xf32> to vector<2x128xbf16>
    %c0_39 = arith.constant 0 : index
    %c0_40 = arith.constant 0 : index
    %66 = vector.load %arg14[%c0_39, %c0_40] : memref<128x32xbf16, #tpu.memory_space<vmem>>, vector<128x32xbf16>
    %cst_41 = arith.constant dense<0.000000e+00> : vector<2x32xf32>
    %67 = tpu.matmul %65, %66, %cst_41 {dimension_numbers = #tpu.dot_dimension_numbers<[1], [0], [0], [1], [0, 0, 1, 1], [], []>} : vector<2x128xbf16>, vector<128x32xbf16>, vector<2x32xf32> -> vector<2x32xf32>
    %c0_42 = arith.constant 0 : index
    %c0_43 = arith.constant 0 : index
    %68 = vector.load %arg15[%c0_42, %c0_43] : memref<1x32xf32, #tpu.memory_space<vmem>>, vector<1x32xf32>
    %69 = vector.broadcast %68 : vector<1x32xf32> to vector<2x32xf32>
    %70 = arith.addf %67, %69 : vector<2x32xf32>
    %cst_44 = arith.constant 0.000000e+00 : f32
    %71 = vector.broadcast %cst_44 : f32 to vector<2x32xf32>
    %72 = arith.maximumf %70, %71 : vector<2x32xf32>
    %cst_45 = arith.constant dense<0.000000e+00> : vector<2xf32>
    %73 = vector.multi_reduction <add>, %72, %cst_45 [1] : vector<2x32xf32> to vector<2xf32>
    %74 = vector.shape_cast %73 : vector<2xf32> to vector<2x1xf32>
    %cst_46 = arith.constant 3.200000e+01 : f32
    %75 = vector.broadcast %cst_46 : f32 to vector<2x1xf32>
    %76 = arith.divf %74, %75 : vector<2x1xf32>
    %77 = arith.mulf %72, %72 : vector<2x32xf32>
    %cst_47 = arith.constant dense<0.000000e+00> : vector<2xf32>
    %78 = vector.multi_reduction <add>, %77, %cst_47 [1] : vector<2x32xf32> to vector<2xf32>
    %79 = vector.shape_cast %78 : vector<2xf32> to vector<2x1xf32>
    %cst_48 = arith.constant 3.200000e+01 : f32
    %80 = vector.broadcast %cst_48 : f32 to vector<2x1xf32>
    %81 = arith.divf %79, %80 : vector<2x1xf32>
    %82 = arith.mulf %76, %76 : vector<2x1xf32>
    %83 = arith.subf %81, %82 : vector<2x1xf32>
    %84 = vector.broadcast %76 : vector<2x1xf32> to vector<2x32xf32>
    %85 = arith.subf %72, %84 : vector<2x32xf32>
    %cst_49 = arith.constant 9.99999974E-6 : f32
    %86 = vector.broadcast %cst_49 : f32 to vector<2x1xf32>
    %87 = arith.addf %83, %86 : vector<2x1xf32>
    %88 = math.rsqrt %87 : vector<2x1xf32>
    %89 = vector.broadcast %88 : vector<2x1xf32> to vector<2x32xf32>
    %90 = arith.mulf %85, %89 : vector<2x32xf32>
    %91 = vector.broadcast %0 : vector<1x32xf32> to vector<2x32xf32>
    %92 = arith.mulf %90, %91 : vector<2x32xf32>
    %93 = vector.broadcast %1 : vector<1x32xf32> to vector<2x32xf32>
    %94 = arith.addf %92, %93 : vector<2x32xf32>
    %95 = arith.subf %94, %24 : vector<2x32xf32>
    %96 = arith.truncf %95 : vector<2x32xf32> to vector<2x32xbf16>
    %c0_50 = arith.constant 0 : index
    %c0_51 = arith.constant 0 : index
    %97 = vector.load %arg18[%c0_50, %c0_51] : memref<32x128xbf16, #tpu.memory_space<vmem>>, vector<32x128xbf16>
    %cst_52 = arith.constant dense<0.000000e+00> : vector<2x128xf32>
    %98 = tpu.matmul %96, %97, %cst_52 {dimension_numbers = #tpu.dot_dimension_numbers<[1], [0], [0], [1], [0, 0, 1, 1], [], []>} : vector<2x32xbf16>, vector<32x128xbf16>, vector<2x128xf32> -> vector<2x128xf32>
    %c0_53 = arith.constant 0 : index
    %c0_54 = arith.constant 0 : index
    %99 = vector.load %arg16[%c0_53, %c0_54] : memref<16x128xbf16, #tpu.memory_space<vmem>>, vector<16x128xbf16>
    %cst_55 = arith.constant dense<0.000000e+00> : vector<2x128xf32>
    %100 = tpu.matmul %49, %99, %cst_55 {dimension_numbers = #tpu.dot_dimension_numbers<[1], [0], [0], [1], [0, 0, 1, 1], [], []>} : vector<2x16xbf16>, vector<16x128xbf16>, vector<2x128xf32> -> vector<2x128xf32>
    %101 = arith.addf %98, %100 : vector<2x128xf32>
    %c0_56 = arith.constant 0 : index
    %c0_57 = arith.constant 0 : index
    %102 = vector.load %arg17[%c0_56, %c0_57] : memref<1x128xf32, #tpu.memory_space<vmem>>, vector<1x128xf32>
    %103 = vector.broadcast %102 : vector<1x128xf32> to vector<2x128xf32>
    %104 = arith.addf %101, %103 : vector<2x128xf32>
    %c0_58 = arith.constant 0 : index
    %c0_59 = arith.constant 0 : index
    %105 = vector.load %arg19[%c0_58, %c0_59] : memref<2x128xf32, #tpu.memory_space<vmem>>, vector<2x128xf32>
    tpu.vector_store %arg19[%c0_58, %c0_59], %104 {strides = array<i32>} : memref<2x128xf32, #tpu.memory_space<vmem>>, vector<2x128xf32>,
    return
  }
  func.func @transform_0(%arg0: i32) -> (i32, i32) {
    %c0_i32 = arith.constant 0 : i32
    %c0_i32_0 = arith.constant 0 : i32
    return %arg0, %c0_i32 : i32, i32
  }
  func.func @transform_1(%arg0: i32) -> (i32, i32) {
    %c0_i32 = arith.constant 0 : i32
    %c0_i32_0 = arith.constant 0 : i32
    %c0_i32_1 = arith.constant 0 : i32
    return %c0_i32, %c0_i32_0 : i32, i32
  }
  func.func @transform_2(%arg0: i32) -> (i32, i32) {
    %c0_i32 = arith.constant 0 : i32
    %c0_i32_0 = arith.constant 0 : i32
    %c0_i32_1 = arith.constant 0 : i32
    return %c0_i32, %c0_i32_0 : i32, i32
  }
  func.func @transform_3(%arg0: i32) -> (i32, i32) {
    %c0_i32 = arith.constant 0 : i32
    %c0_i32_0 = arith.constant 0 : i32
    %c0_i32_1 = arith.constant 0 : i32
    return %c0_i32, %c0_i32_0 : i32, i32
  }
  func.func @transform_4(%arg0: i32) -> (i32, i32) {
    %c0_i32 = arith.constant 0 : i32
    %c0_i32_0 = arith.constant 0 : i32
    %c0_i32_1 = arith.constant 0 : i32
    return %c0_i32, %c0_i32_0 : i32, i32
  }
  func.func @transform_5(%arg0: i32) -> (i32, i32) {
    %c0_i32 = arith.constant 0 : i32
    %c0_i32_0 = arith.constant 0 : i32
    %c0_i32_1 = arith.constant 0 : i32
    return %c0_i32, %c0_i32_0 : i32, i32
  }
  func.func @transform_6(%arg0: i32) -> (i32, i32) {
    %c0_i32 = arith.constant 0 : i32
    %c0_i32_0 = arith.constant 0 : i32
    %c0_i32_1 = arith.constant 0 : i32
    return %c0_i32, %c0_i32_0 : i32, i32
  }
  func.func @transform_7(%arg0: i32) -> (i32, i32) {
    %c0_i32 = arith.constant 0 : i32
    %c0_i32_0 = arith.constant 0 : i32
    %c0_i32_1 = arith.constant 0 : i32
    return %c0_i32, %c0_i32_0 : i32, i32
  }
  func.func @transform_8(%arg0: i32) -> (i32, i32) {
    %c0_i32 = arith.constant 0 : i32
    %c0_i32_0 = arith.constant 0 : i32
    %c0_i32_1 = arith.constant 0 : i32
    return %c0_i32, %c0_i32_0 : i32, i32
  }
  func.func @transform_9(%arg0: i32) -> (i32, i32) {
    %c0_i32 = arith.constant 0 : i32
    %c0_i32_0 = arith.constant 0 : i32
    %c0_i32_1 = arith.constant 0 : i32
    return %c0_i32, %c0_i32_0 : i32, i32
  }
  func.func @transform_10(%arg0: i32) -> (i32, i32) {
    %c0_i32 = arith.constant 0 : i32
    %c0_i32_0 = arith.constant 0 : i32
    %c0_i32_1 = arith.constant 0 : i32
    return %c0_i32, %c0_i32_0 : i32, i32
  }
  func.func @transform_11(%arg0: i32) -> (i32, i32) {
    %c0_i32 = arith.constant 0 : i32
    %c0_i32_0 = arith.constant 0 : i32
    %c0_i32_1 = arith.constant 0 : i32
    return %c0_i32, %c0_i32_0 : i32, i32
  }
  func.func @transform_12(%arg0: i32) -> (i32, i32) {
    %c0_i32 = arith.constant 0 : i32
    %c0_i32_0 = arith.constant 0 : i32
    %c0_i32_1 = arith.constant 0 : i32
    return %c0_i32, %c0_i32_0 : i32, i32
  }
  func.func @transform_13(%arg0: i32) -> (i32, i32) {
    %c0_i32 = arith.constant 0 : i32
    %c0_i32_0 = arith.constant 0 : i32
    %c0_i32_1 = arith.constant 0 : i32
    return %c0_i32, %c0_i32_0 : i32, i32
  }
  func.func @transform_14(%arg0: i32) -> (i32, i32) {
    %c0_i32 = arith.constant 0 : i32
    %c0_i32_0 = arith.constant 0 : i32
    %c0_i32_1 = arith.constant 0 : i32
    return %c0_i32, %c0_i32_0 : i32, i32
  }
  func.func @transform_15(%arg0: i32) -> (i32, i32) {
    %c0_i32 = arith.constant 0 : i32
    %c0_i32_0 = arith.constant 0 : i32
    %c0_i32_1 = arith.constant 0 : i32
    return %c0_i32, %c0_i32_0 : i32, i32
  }
  func.func @transform_16(%arg0: i32) -> (i32, i32) {
    %c0_i32 = arith.constant 0 : i32
    %c0_i32_0 = arith.constant 0 : i32
    %c0_i32_1 = arith.constant 0 : i32
    return %c0_i32, %c0_i32_0 : i32, i32
  }
  func.func @transform_17(%arg0: i32) -> (i32, i32) {
    %c0_i32 = arith.constant 0 : i32
    %c0_i32_0 = arith.constant 0 : i32
    %c0_i32_1 = arith.constant 0 : i32
    return %c0_i32, %c0_i32_0 : i32, i32
  }
  func.func @transform_18(%arg0: i32) -> (i32, i32) {
    %c0_i32 = arith.constant 0 : i32
    %c0_i32_0 = arith.constant 0 : i32
    return %arg0, %c0_i32 : i32, i32
  }
}

</mosaic_0001>

<bundles_post_ra>
// kernel: tpu_custom_call.1
= control target key start
LH: loop header
LB: loop body
LE: loop exit
PB: predicated region body
PF: predicated region fallthrough
CT: control target
= control target key end

     0   :  { %s1225_s0 = inlined_call_operand.vmem [shape: f32[2,32], index: 0, kind: input, shape index: {}]   ;;  %s1226_s1 = inlined_call_operand.vmem [shape: f32[1,32], index: 1, kind: input, shape index: {}]   ;;  %s1227_s2 = inlined_call_operand.vmem [shape: f32[1,32], index: 2, kind: input, shape index: {}]   ;;  %s1228_s3 = inlined_call_operand.vmem [shape: bf16[32,128], index: 3, kind: input, shape index: {}]   ;;  %s1229_s4 = inlined_call_operand.vmem [shape: f32[1,128], index: 4, kind: input, shape index: {}]   ;;  %s1230_s5 = inlined_call_operand.vmem [shape: bf16[128,32], index: 5, kind: input, shape index: {}]   ;;  %s1231_s6 = inlined_call_operand.vmem [shape: f32[1,32], index: 6, kind: input, shape index: {}]   ;;  %s1232_s7 = inlined_call_operand.vmem [shape: bf16[32,16], index: 7, kind: input, shape index: {}]   ;;  %s1233_s8 = inlined_call_operand.vmem [shape: f32[1,16], index: 8, kind: input, shape index: {}]   ;;  %s1234_s9 = inlined_call_operand.vmem [shape: bf16[16,32], index: 9, kind: input, shape index: {}]   ;;  %s1235_s10 = inlined_call_operand.vmem [shape: f32[1,32], index: 10, kind: input, shape index: {}]   ;;  %s1236_s11 = inlined_call_operand.vmem [shape: bf16[32,128], index: 11, kind: input, shape index: {}]   ;;  %s1237_s12 = inlined_call_operand.vmem [shape: f32[1,128], index: 12, kind: input, shape index: {}]   ;;  %s1238_s13 = inlined_call_operand.vmem [shape: bf16[128,32], index: 13, kind: input, shape index: {}]   ;;  %s1239_s14 = inlined_call_operand.vmem [shape: f32[1,32], index: 14, kind: input, shape index: {}]   ;;  %s1240_s15 = inlined_call_operand.vmem [shape: bf16[16,128], index: 15, kind: input, shape index: {}]   ;;  %s1241_s16 = inlined_call_operand.vmem [shape: f32[1,128], index: 16, kind: input, shape index: {}]   ;;  %s1242_s17 = inlined_call_operand.vmem [shape: bf16[32,128], index: 17, kind: input, shape index: {}]   ;;  %s1243_s18 = inlined_call_operand.hbm [shape: f32[2,128], index: 18, kind: output, shape index: {}]  }
   0x1   :  { %1244 = sst [smem:[#allocation5_spill]] %s1225_s0 }
   0x2   :  { %1245 = sst [smem:[#allocation6_spill]] %s1226_s1 }
   0x3   :  { %1246 = sst [smem:[#allocation7_spill]] %s1227_s2 }
   0x4   :  { %s1247_s29 = sld [smem:[#allocation5_spill]]  ;;  %vm64_vm0 = vcmask 254976  }
   0xa   :  { %v63_v0 = vld [vmem:[%s1247_s29] sm:$0x3] }
   0xb   :  { %v65_v1 = vsel %vm64_vm0, %v63_v0, 0.0  ;;  %v70_v2 = vmul.f32 %v63_v0, %v63_v0 }
   0xc   :  { %66 = vadd.xlane.f32.xlu0 %v65_v1 }
   0xd   :  { %v71_v3 = vsel %vm64_vm0, %v70_v2, 0.0 }
  0x10   :  { %72 = vadd.xlane.f32.xlu0 %v71_v3 }
  0x11   :  { %23 = vsyncpa [#allocation3], 0  ;;  %v898_v4 = vld [vmem:[%s1228_s3 + $0x8] sm:$0xff]   ;;  %v950_v5 = vmov 0.0   ;;  %vm951_vm1 = vmmov 0   ;;  %v899_v6 = vld [vmem:[%s1228_s3] sm:$0xff]  }
  0x12   :  { %811 = vmatprep.subr.bf16.mxu1 %v950_v5  ;;  %815 = vmatprep.mubr.msk.bf16.mxu1 %vm951_vm1, %v950_v5  ;;  %s1248_s21 = sld [smem:[#allocation6_spill]]  ;;  %vm119_vm2 = vcmask 261120   ;;  %v900_v21 = vld [vmem:[%s1230_s5 + $0x38] sm:$0xff]   ;;  %v901_v23 = vld [vmem:[%s1230_s5 + $0x30] sm:$0xff]   ;;  %v902_v24 = vld [vmem:[%s1230_s5 + $0x28] sm:$0xff]   ;;  %vm361_vm3 = vcmask 130048  }
  0x13   :  { %812 = vmatpush3.bf16.msra.mxu1 %v898_v4  ;;  %839 = vmatprep.subr.bf16.mxu0 %v950_v5  ;;  %s1249_s23 = sld [smem:[#allocation7_spill]]  ;;  %v903_v25 = vld [vmem:[%s1230_s5 + $0x20] sm:$0xff]   ;;  %v904_v26 = vld [vmem:[%s1230_s5 + $0x18] sm:$0xff]   ;;  %v905_v27 = vld [vmem:[%s1230_s5 + $0x10] sm:$0xff]  }
  0x14   :  { %813 = vmatprep.subr.bf16.mxu1 %v950_v5  ;;  %843 = vmatprep.mubr.msk.bf16.mxu0 %vm951_vm1, %v950_v5  ;;  %v906_v28 = vld [vmem:[%s1230_s5 + $0x8] sm:$0xff]   ;;  %v907_v29 = vld [vmem:[%s1230_s5] sm:$0xff]  }
  0x15   :  { %v738_v30 = vld [vmem:[%s1229_s4] ss:$0 sm:$0xff]  ;;  %v908_v38 = vld [vmem:[%s1232_s7 + $0x8] sm:$0xff]  }
  0x16   :  { %840 = vmatpush3.bf16.msra.mxu0 %v908_v38  ;;  %v909_v39 = vld [vmem:[%s1232_s7] sm:$0xff]   ;;  %v912_v56 = vld [vmem:[%s1236_s11 + $0x8] sm:$0xff]  }
  0x17   :  { %814 = vmatpush3.bf16.msra.mxu1 %v899_v6  ;;  %841 = vmatprep.subr.bf16.mxu0 %v950_v5  ;;  %v742_v40 = vld [vmem:[%s1231_s6] ss:$0 sm:$0xff]  ;;  %v914_v6 = vld [vmem:[%s1238_s13 + $0x38] sm:$0xff]   ;;  %v922_v38 = vld [vmem:[%s1242_s17 + $0x8] sm:$0xff]  }
  0x18   :  { %819 = vmatprep.subr.bf16.mxu1 %v950_v5  ;;  %v1070_v16 = vld [vmem:[%s1248_s21] ss:$0 sm:$0xff] }
  0x19   :  { %v1075_v18 = vld [vmem:[%s1249_s23] ss:$0 sm:$0xff] }
  0x1a   :  { %842 = vmatpush3.bf16.msra.mxu0 %v909_v39  ;;  %v910_v46 = vld [vmem:[%s1234_s9] sm:$0xff]  }
  0x1b   :  { %847 = vmatprep.subr.bf16.mxu0 %v950_v5  ;;  %v911_v49 = vld [vmem:[%s1240_s15] sm:$0xff]   ;;  %s952_s15 = smov [#allocation2]  }
  0x1c   :  { %v751_v50 = vld [vmem:[%s1233_s8] ss:$0 sm:$0xff]  ;;  %s728_s20 = sshll.u32 %s952_s15, 4  ;;  %s729_s20 = int_to_ptr.vmem [resolvable:$true] %s728_s20 }
  0x1d   :  { %v913_v59 = vld [vmem:[%s1236_s11] sm:$0xff]   ;;  %s928_s21 = scalar_lea.vmem %s729_s20, 32  ;;  %p933_p1 = scmp.lt.s32.totalorder %s729_s20, %s729_s20 }
  0x1e   :  { %v755_v60 = vld [vmem:[%s1235_s10] ss:$0 sm:$0xff]  ;;  %p929_p0 = scmp.ne.s32.totalorder %s729_s20, %s928_s21  ;;  %p934_p2 = scmp.lt.s32.totalorder %s928_s21, %s928_s21 }
  0x1f   :  { %v923_v39 = vld [vmem:[%s1242_s17] sm:$0xff]  }
  0x20   :  { %p935_p3 = por %p934_p2, %p933_p1 }
  0x22   :  { %p936_p4 = pnand %p935_p3, %p929_p0 }
  0x95   :  { %v67_v7 = vpop.xlane.xlu0 %66 }
  0x96   :  { %v69_v8 = vmul.f32 0.03125, %v67_v7 }
  0x98   :  { %v75_v10 = vmul.f32 %v69_v8, %v69_v8  ;;  %v77_v14 = vsub.f32 %v63_v0, %v69_v8 }
  0x99   :  { %v73_v9 = vpop.xlane.xlu0 %72 }
  0x9a   :  { %v74_v11 = vmul.f32 0.03125, %v73_v9 }
  0x9c   :  { %v76_v12 = vsub.f32 %v74_v11, %v75_v10  ;;  %v915_v10 = vld [vmem:[%s1238_s13 + $0x30] sm:$0xff]   ;;  %v916_v11 = vld [vmem:[%s1238_s13 + $0x28] sm:$0xff]  }
  0x9e   :  { %v78_v13 = vadd.f32 1e-05, %v76_v12  ;;  %v917_v12 = vld [vmem:[%s1238_s13 + $0x20] sm:$0xff]  }
  0xa0   :  { %924 = vrsqrt.f32 %v78_v13  ;;  %v918_v13 = vld [vmem:[%s1238_s13 + $0x18] sm:$0xff]  }
  0xad   :  { %v925_v15 = vpop.eup %924 }
  0xae   :  { %v80_v17 = vmul.f32 %v925_v15, %v77_v14  ;;  %v919_v14 = vld [vmem:[%s1238_s13 + $0x10] sm:$0xff]   ;;  %v920_v15 = vld [vmem:[%s1238_s13 + $0x8] sm:$0xff]  }
  0xb0   :  { %v87_v19 = vmul.f32 %v1070_v16, %v80_v17  ;;  %v921_v17 = vld [vmem:[%s1238_s13] sm:$0xff]  }
  0xb2   :  { %v1079_v20 = vadd.f32 %v1075_v18, %v87_v19  ;;  %v758_v19 = vld [vmem:[%s1237_s12] ss:$0 sm:$0xff] }
  0xb4   :  { %v95_v22 = vpack.c.bf16 %v1079_v20, %v1079_v20 }
  0xb6   :  { %816 = vmatmul.mubr.msk.bf16.vlgmr.msra.gmra.mxu1 %vm119_vm2, %v95_v22 }
  0xb7   :  { %820 = vmatpush3.bf16.msra.mxu1 %v900_v21  ;;  %835 = vmatprep.mubr.msk.bf16.mxu1 %vm951_vm1, %v950_v5 }
  0xb8   :  { %821 = vmatprep.subr.bf16.mxu1 %v950_v5 }
  0xbb   :  { %822 = vmatpush3.bf16.msra.mxu1 %v901_v23 }
  0xbc   :  { %823 = vmatprep.subr.bf16.mxu1 %v950_v5 }
  0xbf   :  { %824 = vmatpush3.bf16.msra.mxu1 %v902_v24 }
  0xc0   :  { %825 = vmatprep.subr.bf16.mxu1 %v950_v5 }
  0xc3   :  { %826 = vmatpush3.bf16.msra.mxu1 %v903_v25 }
  0xc4   :  { %827 = vmatprep.subr.bf16.mxu1 %v950_v5 }
  0xc7   :  { %828 = vmatpush3.bf16.msra.mxu1 %v904_v26 }
  0xc8   :  { %829 = vmatprep.subr.bf16.mxu1 %v950_v5 }
  0xcb   :  { %830 = vmatpush3.bf16.msra.mxu1 %v905_v27 }
  0xcc   :  { %831 = vmatprep.subr.bf16.mxu1 %v950_v5 }
  0xcf   :  { %832 = vmatpush3.bf16.msra.mxu1 %v906_v28  ;;  %v762_v28 = vld [vmem:[%s1239_s14] ss:$0 sm:$0xff] }
  0xd0   :  { %833 = vmatprep.subr.bf16.mxu1 %v950_v5 }
  0xd3   :  { %834 = vmatpush3.bf16.msra.mxu1 %v907_v29 }
  0xd4   :  { %881 = vmatprep.subr.bf16.mxu1 %v950_v5 }
 0x176   :  { %v157_v31 = vpop.f32.mrf.mxu1 }
 0x177   :  { %v158_v32 = vadd.f32 %v738_v30, %v157_v31 }
 0x178   :  { %v817_v33 = vpop.f32.mrf.mxu1 }
 0x179   :  { %v163_v34 = vmax.f32 %v158_v32, 0.0 }
 0x17a   :  { %v160_v35 = vpop.f32.mrf.mxu1 }
 0x17b   :  { %v164_v36 = vpack.c.bf16 %v163_v34, %v163_v34 }
 0x17c   :  { %v818_v37 = vpop.f32.mrf.mxu1 }
 0x17d   :  { %836 = vmatmul.mubr.bf16.vlgmr.msra.gmra.mxu1 %v164_v36 }
 0x17e   :  { %883 = vmatprep.mubr.msk.bf16.mxu1 %vm951_vm1, %v950_v5  ;;  %882 = vmatpush3.bf16.msra.mxu1 %v911_v49 }
 0x17f   :  { %887 = vmatprep.subr.bf16.mxu1 %v950_v5 }
 0x23d   :  { %v270_v41 = vpop.f32.mrf.mxu1 }
 0x23e   :  { %v271_v42 = vadd.f32 %v742_v40, %v270_v41 }
 0x23f   :  { %v837_v43 = vpop.f32.mrf.mxu1 }
 0x240   :  { %v276_v44 = vmax.f32 %v271_v42, 0.0 }
 0x241   :  { %v273_v45 = vpop.f32.mrf.mxu1 }
 0x242   :  { %v277_v47 = vpack.c.bf16 %v276_v44, %v276_v44 }
 0x243   :  { %v838_v48 = vpop.f32.mrf.mxu1 }
 0x244   :  { %844 = vmatmul.mubr.msk.bf16.vlgmr.msra.gmra.mxu0 %vm119_vm2, %v277_v47 }
 0x245   :  { %848 = vmatpush3.bf16.msra.mxu0 %v910_v46  ;;  %849 = vmatprep.mubr.msk.bf16.mxu0 %vm951_vm1, %v950_v5 }
 0x246   :  { %853 = vmatprep.subr.bf16.mxu0 %v950_v5 }
 0x304   :  { %v338_v51 = vpop.f32.mrf.mxu0 }
 0x305   :  { %v339_v52 = vadd.f32 %v751_v50, %v338_v51 }
 0x306   :  { %v845_v53 = vpop.f32.mrf.mxu0 }
 0x307   :  { %v344_v54 = vmax.f32 %v339_v52, 0.0 }
 0x308   :  { %v341_v55 = vpop.f32.mrf.mxu0 }
 0x309   :  { %v345_v57 = vpack.c.bf16 %v344_v54, %v344_v54  ;;  %v776_v54 = vld [vmem:[%s1241_s16] ss:$0 sm:$0xff] }
 0x30a   :  { %v846_v58 = vpop.f32.mrf.mxu0 }
 0x30b   :  { %850 = vmatmul.mubr.msk.bf16.vlgmr.msra.gmra.mxu0 %vm361_vm3, %v345_v57  ;;  %884 = vmatmul.mubr.msk.bf16.vlgmr.msra.gmra.mxu1 %vm361_vm3, %v345_v57 }
 0x30c   :  { %854 = vmatpush3.bf16.msra.mxu0 %v912_v56  ;;  %857 = vmatprep.mubr.msk.bf16.mxu0 %vm951_vm1, %v950_v5 }
 0x30d   :  { %855 = vmatprep.subr.bf16.mxu0 %v950_v5  ;;  %891 = vmatprep.mubr.msk.bf16.mxu1 %vm951_vm1, %v950_v5 }
 0x30e   :  { %888 = vmatpush3.bf16.msra.mxu1 %v922_v38 }
 0x30f   :  { %889 = vmatprep.subr.bf16.mxu1 %v950_v5 }
 0x310   :  { %856 = vmatpush3.bf16.msra.mxu0 %v913_v59 }
 0x311   :  { %861 = vmatprep.subr.bf16.mxu0 %v950_v5 }
 0x312   :  { %890 = vmatpush3.bf16.msra.mxu1 %v923_v39 }
 0x3cb   :  { %v399_v61 = vpop.f32.mrf.mxu0  ;;  %v1163_v62 = vpop.f32.mrf.mxu1 }
 0x3cc   :  { %v400_v63 = vadd.f32 %v755_v60, %v399_v61 }
 0x3cd   :  { %v851_v0 = vpop.f32.mrf.mxu0  ;;  %v885_v1 = vpop.f32.mrf.mxu1 }
 0x3ce   :  { %v405_v2 = vmax.f32 %v400_v63, 0.0 }
 0x3cf   :  { %v402_v3 = vpop.f32.mrf.mxu0  ;;  %v655_v4 = vpop.f32.mrf.mxu1 }
 0x3d0   :  { %v406_v7 = vpack.c.bf16 %v405_v2, %v405_v2 }
 0x3d1   :  { %v852_v8 = vpop.f32.mrf.mxu0  ;;  %v886_v9 = vpop.f32.mrf.mxu1 }
 0x3d2   :  { %858 = vmatmul.mubr.msk.bf16.vlgmr.msra.gmra.mxu0 %vm119_vm2, %v406_v7 }
 0x3d3   :  { %862 = vmatpush3.bf16.msra.mxu0 %v914_v6  ;;  %877 = vmatprep.mubr.msk.bf16.mxu0 %vm951_vm1, %v950_v5 }
 0x3d4   :  { %863 = vmatprep.subr.bf16.mxu0 %v950_v5 }
 0x3d7   :  { %864 = vmatpush3.bf16.msra.mxu0 %v915_v10 }
 0x3d8   :  { %865 = vmatprep.subr.bf16.mxu0 %v950_v5 }
 0x3db   :  { %866 = vmatpush3.bf16.msra.mxu0 %v916_v11 }
 0x3dc   :  { %867 = vmatprep.subr.bf16.mxu0 %v950_v5 }
 0x3df   :  { %868 = vmatpush3.bf16.msra.mxu0 %v917_v12 }
 0x3e0   :  { %869 = vmatprep.subr.bf16.mxu0 %v950_v5 }
 0x3e3   :  { %870 = vmatpush3.bf16.msra.mxu0 %v918_v13 }
 0x3e4   :  { %871 = vmatprep.subr.bf16.mxu0 %v950_v5 }
 0x3e7   :  { %872 = vmatpush3.bf16.msra.mxu0 %v919_v14 }
 0x3e8   :  { %873 = vmatprep.subr.bf16.mxu0 %v950_v5 }
 0x3eb   :  { %874 = vmatpush3.bf16.msra.mxu0 %v920_v15 }
 0x3ec   :  { %875 = vmatprep.subr.bf16.mxu0 %v950_v5 }
 0x3ef   :  { %876 = vmatpush3.bf16.msra.mxu0 %v921_v17 }
 0x492   :  { %v467_v21 = vpop.f32.mrf.mxu0 }
 0x493   :  { %v468_v22 = vadd.f32 %v758_v19, %v467_v21 }
 0x494   :  { %v859_v23 = vpop.f32.mrf.mxu0 }
 0x495   :  { %v473_v24 = vmax.f32 %v468_v22, 0.0 }
 0x496   :  { %v470_v25 = vpop.f32.mrf.mxu0 }
 0x497   :  { %v474_v26 = vpack.c.bf16 %v473_v24, %v473_v24 }
 0x498   :  { %v860_v27 = vpop.f32.mrf.mxu0 }
 0x499   :  { %878 = vmatmul.mubr.bf16.vlgmr.msra.gmra.mxu0 %v474_v26 }
 0x559   :  { %v580_v29 = vpop.f32.mrf.mxu0 }
 0x55a   :  { %v581_v30 = vadd.f32 %v762_v28, %v580_v29 }
 0x55b   :  { %v879_v31 = vpop.f32.mrf.mxu0 }
 0x55c   :  { %v586_v32 = vmax.f32 %v581_v30, 0.0 }
 0x55d   :  { %v583_v33 = vpop.f32.mrf.mxu0 }
 0x55e   :  { %v587_v34 = vsel %vm64_vm0, %v586_v32, 0.0  ;;  %v591_v35 = vmul.f32 %v586_v32, %v586_v32 }
 0x55f   :  { %588 = vadd.xlane.f32.xlu1 %v587_v34  ;;  %v880_v36 = vpop.f32.mrf.mxu0 }
 0x560   :  { %v592_v37 = vsel %vm64_vm0, %v591_v35, 0.0 }
 0x563   :  { %593 = vadd.xlane.f32.xlu1 %v592_v37 }
 0x5e8   :  { %v589_v40 = vpop.xlane.xlu1 %588 }
 0x5e9   :  { %v590_v41 = vmul.f32 0.03125, %v589_v40 }
 0x5eb   :  { %v596_v43 = vmul.f32 %v590_v41, %v590_v41  ;;  %v598_v47 = vsub.f32 %v586_v32, %v590_v41 }
 0x5ec   :  { %v594_v42 = vpop.xlane.xlu1 %593 }
 0x5ed   :  { %v595_v44 = vmul.f32 0.03125, %v594_v42 }
 0x5ef   :  { %v597_v45 = vsub.f32 %v595_v44, %v596_v43 }
 0x5f1   :  { %v599_v46 = vadd.f32 1e-05, %v597_v45 }
 0x5f3   :  { %926 = vrsqrt.f32 %v599_v46 }
 0x600   :  { %v927_v48 = vpop.eup %926 }
 0x601   :  { %v601_v49 = vmul.f32 %v927_v48, %v598_v47 }
 0x603   :  { %v602_v50 = vmul.f32 %v1070_v16, %v601_v49 }
 0x605   :  { %v603_v51 = vadd.f32 %v1075_v18, %v602_v50 }
 0x607   :  { %v604_v52 = vsub.f32 %v603_v51, %v1079_v20 }
 0x609   :  { %v605_v53 = vpack.c.bf16 %v604_v52, %v604_v52 }
 0x60b   :  { %892 = vmatmul.mubr.msk.bf16.vlgmr.msra.gmra.mxu1 %vm119_vm2, %v605_v53 }
 0x6cb   :  { %v707_v5 = vpop.f32.mrf.mxu1 }
 0x6cc   :  { %v708_v55 = vadd.f32 %v707_v5, %v1163_v62 }
 0x6cd   :  { %v893_v56 = vpop.f32.mrf.mxu1 }
 0x6ce   :  { %v720_v57 = vadd.f32 %v776_v54, %v708_v55 }
 0x6cf   :  { %v710_v16 = vpop.f32.mrf.mxu1 }
 0x6d0   :  { %721 = vst [vmem:[#allocation2] sm:$0x3] %v720_v57 }
 0x6d1   :  { %v894_v18 = vpop.f32.mrf.mxu1 }
 0x6d2   :  { %939 = shalt.err (!%p936_p4)
}
 0x6d3   :  { %731 = dma.vmem_to_hbm [thread:$0]  %s729_s20, 32, %s1243_s18, [#allocation3]  }
 0x6d4   :  { %948 = dma.done.wait [#allocation3], 32  }
 0x6d5   :  { %949 = vsyncadd [#allocation3], 4294967264 }
 0x6d6   :  { %735 = vsyncpa [#allocation3], 1 }

</bundles_post_ra>
